<compile_context>
chip_gen: v7x
topology: tpu7x:2x2x1
jax: 0.10.0
libtpu: 0.0.40
codegen_flags: <defaults>
</compile_context>

<pallas_src>
import jax
import jax.numpy as jnp
from jax.experimental import pallas as pl
from jax.experimental.pallas import tpu as pltpu

W = 1024     # lane-dense block width (multiple of 128) -> wide unmasked stores
TR = 512     # rows (sublanes) per block; (TR, W) f32 block = 2 MiB per buffer
_LN2 = 0.6931471805599453


def _csinh_kernel(re_ref, im_ref, out_re_ref, out_im_ref):
    a = re_ref[...]
    b = im_ref[...]
    # 0.5*exp(a) and 0.5*exp(-a) via shifted exponent args (EUP); avoids the
    # exact-reciprocal divide and extends the finite range to |a| ~ 89.4.
    ep = jnp.exp(a - _LN2)
    em = jnp.exp(-a - _LN2)
    out_re_ref[...] = (ep - em) * jnp.cos(b)   # sinh(a) * cos(b)
    out_im_ref[...] = (ep + em) * jnp.sin(b)   # cosh(a) * sin(b)


def csinh_planar(re: jax.Array, im: jax.Array):
    """Fast path: planar float32 real/imag in, planar float32 real/imag out."""
    assert re.shape == im.shape
    orig_shape = re.shape
    re = jnp.asarray(re, jnp.float32).reshape(-1)
    im = jnp.asarray(im, jnp.float32).reshape(-1)
    n = re.shape[0]

    # Pad only to a multiple of W (reshape requirement).  The (8,128) rule applies
    # to the BlockSpec, and partial final row-blocks are edge-masked by Pallas.
    padded = pl.cdiv(n, W) * W
    pad = padded - n
    if pad:
        re = jnp.pad(re, (0, pad))
        im = jnp.pad(im, (0, pad))

    rows = padded // W
    tr = min(TR, rows)            # small inputs -> one exact full-array block
    re2 = re.reshape(rows, W)
    im2 = im.reshape(rows, W)

    row_spec = pl.BlockSpec((tr, W), lambda i: (i, 0))

    out_re, out_im = pl.pallas_call(
        _csinh_kernel,
        out_shape=(
            jax.ShapeDtypeStruct((rows, W), jnp.float32),
            jax.ShapeDtypeStruct((rows, W), jnp.float32),
        ),
        grid_spec=pltpu.PrefetchScalarGridSpec(
            num_scalar_prefetch=0,
            grid=(pl.cdiv(rows, tr),),
            in_specs=[row_spec, row_spec],
            out_specs=[row_spec, row_spec],
        ),
        compiler_params=pltpu.CompilerParams(
            dimension_semantics=("parallel",),     # v7x: shard rows across both TCs
            vmem_limit_bytes=32 * 1024 * 1024,     # usage ~16 MiB incl. double buffers
        ),
    )(re2, im2)

    out_re = out_re.reshape(-1)
    out_im = out_im.reshape(-1)
    if pad:
        out_re = out_re[:n]
        out_im = out_im[:n]
    return out_re.reshape(orig_shape), out_im.reshape(orig_shape)


def csinh(x: jax.Array) -> jax.Array:
    """Complex sinh applied elementwise (complex64 in/out).

    NOTE: the real/imag split before the kernel and lax.complex after it are full
    extra HBM passes; prefer csinh_planar() if the surrounding pipeline can stay
    planar.
    """
    x = jnp.asarray(x)
    if x.dtype != jnp.complex64:
        x = x.astype(jnp.complex64)
    re_out, im_out = csinh_planar(jnp.real(x), jnp.imag(x))
    return jax.lax.complex(re_out, im_out)


if __name__ == "__main__":
    key = jax.random.PRNGKey(0)
    kr, ki = jax.random.split(key)
    # NCHW-shaped complex input, small test size.
    shape = (2, 4, 16, 16)
    x_re = jax.random.normal(kr, shape, dtype=jnp.float32)
    x_im = jax.random.normal(ki, shape, dtype=jnp.float32)
    x = jax.lax.complex(x_re, x_im)

    out = jax.block_until_ready(csinh(x))

    # Reference check against jnp.sinh on complex input.
    ref = jnp.sinh(x)
    assert out.shape == x.shape and out.dtype == jnp.complex64
    assert jnp.allclose(out, ref, atol=1e-5, rtol=1e-5)

    print("KERNEL_OK")
</pallas_src>

<mosaic_0001>
module attributes {stable_mosaic.version = 11 : i64} {
  func.func @_csinh_kernel(%arg0: i32, %arg1: memref<2x1024xf32, #tpu.memory_space<vmem>>, %arg2: memref<2x1024xf32, #tpu.memory_space<vmem>>, %arg3: memref<2x1024xf32, #tpu.memory_space<vmem>>, %arg4: memref<2x1024xf32, #tpu.memory_space<vmem>>) attributes {dimension_semantics = [#tpu.dimension_semantics<parallel>], iteration_bounds = array<i64: 1>, scalar_prefetch = 0 : i64, scratch_operands = 0 : i64, tpu.core_type = #tpu.core_type<tc>, window_params = [{transform_indices = @transform_0, window_bounds = array<i64: 2, 1024>}, {transform_indices = @transform_1, window_bounds = array<i64: 2, 1024>}, {transform_indices = @transform_2, window_bounds = array<i64: 2, 1024>}, {transform_indices = @transform_3, window_bounds = array<i64: 2, 1024>}]} {
    %c0 = arith.constant 0 : index
    %c0_0 = arith.constant 0 : index
    %0 = vector.load %arg1[%c0, %c0_0] : memref<2x1024xf32, #tpu.memory_space<vmem>>, vector<2x1024xf32>
    %c0_1 = arith.constant 0 : index
    %c0_2 = arith.constant 0 : index
    %1 = vector.load %arg2[%c0_1, %c0_2] : memref<2x1024xf32, #tpu.memory_space<vmem>>, vector<2x1024xf32>
    %cst = arith.constant 0.693147182 : f32
    %2 = vector.broadcast %cst : f32 to vector<2x1024xf32>
    %3 = arith.subf %0, %2 : vector<2x1024xf32>
    %4 = math.exp %3 : vector<2x1024xf32>
    %cst_3 = arith.constant 0.000000e+00 : f32
    %5 = vector.broadcast %cst_3 : f32 to vector<2x1024xf32>
    %6 = arith.subf %5, %0 : vector<2x1024xf32>
    %cst_4 = arith.constant 0.693147182 : f32
    %7 = vector.broadcast %cst_4 : f32 to vector<2x1024xf32>
    %8 = arith.subf %6, %7 : vector<2x1024xf32>
    %9 = math.exp %8 : vector<2x1024xf32>
    %10 = arith.subf %4, %9 : vector<2x1024xf32>
    %11 = math.cos %1 : vector<2x1024xf32>
    %12 = arith.mulf %10, %11 : vector<2x1024xf32>
    %c0_5 = arith.constant 0 : index
    %c0_6 = arith.constant 0 : index
    %13 = vector.load %arg3[%c0_5, %c0_6] : memref<2x1024xf32, #tpu.memory_space<vmem>>, vector<2x1024xf32>
    tpu.vector_store %arg3[%c0_5, %c0_6], %12 {strides = array<i32>} : memref<2x1024xf32, #tpu.memory_space<vmem>>, vector<2x1024xf32>,
    %14 = arith.addf %4, %9 : vector<2x1024xf32>
    %15 = math.sin %1 : vector<2x1024xf32>
    %16 = arith.mulf %14, %15 : vector<2x1024xf32>
    %c0_7 = arith.constant 0 : index
    %c0_8 = arith.constant 0 : index
    %17 = vector.load %arg4[%c0_7, %c0_8] : memref<2x1024xf32, #tpu.memory_space<vmem>>, vector<2x1024xf32>
    tpu.vector_store %arg4[%c0_7, %c0_8], %16 {strides = array<i32>} : memref<2x1024xf32, #tpu.memory_space<vmem>>, vector<2x1024xf32>,
    return
  }
  func.func @transform_0(%arg0: i32) -> (i32, i32) {
    %c0_i32 = arith.constant 0 : i32
    %c0_i32_0 = arith.constant 0 : i32
    return %arg0, %c0_i32 : i32, i32
  }
  func.func @transform_1(%arg0: i32) -> (i32, i32) {
    %c0_i32 = arith.constant 0 : i32
    %c0_i32_0 = arith.constant 0 : i32
    return %arg0, %c0_i32 : i32, i32
  }
  func.func @transform_2(%arg0: i32) -> (i32, i32) {
    %c0_i32 = arith.constant 0 : i32
    %c0_i32_0 = arith.constant 0 : i32
    return %arg0, %c0_i32 : i32, i32
  }
  func.func @transform_3(%arg0: i32) -> (i32, i32) {
    %c0_i32 = arith.constant 0 : i32
    %c0_i32_0 = arith.constant 0 : i32
    return %arg0, %c0_i32 : i32, i32
  }
}

</mosaic_0001>

<bundles_post_ra>
// kernel: tpu_custom_call.1
= control target key start
LH: loop header
LB: loop body
LE: loop exit
PB: predicated region body
PF: predicated region fallthrough
CT: control target
= control target key end

     0   :  { %9 = vsyncpa [#allocation3], 0  ;;  %s816_s0 = inlined_call_operand.hbm [shape: f32[2,1024], index: 0, kind: input, shape index: {}]   ;;  %s817_s1 = inlined_call_operand.hbm [shape: f32[2,1024], index: 1, kind: input, shape index: {}]   ;;  %s818_s2 = inlined_call_operand.hbm [shape: f32[2,1024], index: 2, kind: output, shape index: {0}]   ;;  %s819_s3 = inlined_call_operand.hbm [shape: f32[2,1024], index: 3, kind: output, shape index: {1}]  }
   0x1   :  { %10 = vsyncpa [#allocation6], 0 }
   0x2   :  { %11 = vsyncpa [#allocation4], 0 }
   0x3   :  { %12 = vsyncpa [#allocation9], 0  ;;  %s663_s12 = smov [#allocation2]   ;;  %s664_s14 = smov [#allocation5]  }
   0x4   :  { %s19_s13 = sshll.u32 %s663_s12, 4  ;;  %s29_s15 = sshll.u32 %s664_s14, 4  ;;  %s20_s13 = int_to_ptr.vmem [resolvable:$true] %s19_s13  ;;  %s30_s15 = int_to_ptr.vmem [resolvable:$true] %s29_s15 }
   0x5   :  { %s567_s18 = scalar_lea.hbm %s816_s0, 256 }
   0x6   :  { %p568_p0 = scmp.ne.s32.totalorder %s816_s0, %s567_s18  ;;  %p571_p1 = scmp.lt.u32.totalorder %s567_s18, %s816_s0 }
   0x8   :  { %p573_p2 = pnand %p571_p1, %p568_p0 }
   0xa   :  { %576 = shalt.err (!%p573_p2)
}
   0xb   :  { %s577_s23 = scalar_lea.vmem %s20_s13, 256  ;;  %p582_p4 = scmp.lt.s32.totalorder %s20_s13, %s20_s13 }
   0xc   :  { %p578_p3 = scmp.ne.s32.totalorder %s20_s13, %s577_s23  ;;  %p583_p5 = scmp.lt.s32.totalorder %s577_s23, %s577_s23 }
   0xe   :  { %p584_p6 = por %p583_p5, %p582_p4 }
  0x10   :  { %p585_p7 = pnand %p584_p6, %p578_p3 }
  0x12   :  { %588 = shalt.err (!%p585_p7)
}
  0x13   :  { %22 = dma.hbm_to_vmem [thread:$0]  %s816_s0, 256, %s20_s13, [#allocation3]  }
  0x14   :  { %s589_s28 = scalar_lea.hbm %s817_s1, 256 }
  0x15   :  { %p590_p8 = scmp.ne.s32.totalorder %s817_s1, %s589_s28  ;;  %p593_p9 = scmp.lt.u32.totalorder %s589_s28, %s817_s1 }
  0x17   :  { %p595_p10 = pnand %p593_p9, %p590_p8 }
  0x19   :  { %598 = shalt.err (!%p595_p10)
}
  0x1a   :  { %s599_s6 = scalar_lea.vmem %s30_s15, 256  ;;  %p604_p12 = scmp.lt.s32.totalorder %s30_s15, %s30_s15 }
  0x1b   :  { %p600_p11 = scmp.ne.s32.totalorder %s30_s15, %s599_s6  ;;  %p605_p13 = scmp.lt.s32.totalorder %s599_s6, %s599_s6 }
  0x1d   :  { %p606_p0 = por %p605_p13, %p604_p12 }
  0x1f   :  { %p607_p1 = pnand %p606_p0, %p600_p11 }
  0x21   :  { %610 = shalt.err (!%p607_p1)
}
  0x22   :  { %32 = dma.hbm_to_vmem [thread:$0]  %s817_s1, 256, %s30_s15, [#allocation6]  }
  0x23   :  { %655 = dma.done.wait [#allocation3], 256  }
  0x24   :  { %656 = vsyncadd [#allocation3], 4294967040 }
  0x25   :  { %657 = dma.done.wait [#allocation6], 256  }
  0x26   :  { %658 = vsyncadd [#allocation6], 4294967040  ;;  %v717_v0 = vld [vmem:[#allocation5] sm:$0xff]  ;;  %v721_v3 = vld [vmem:[#allocation5 + $0x8] sm:$0xff]  ;;  %v665_v17 = vmov 683565275  }
  0x27   :  { %v62_v1 = vand.u32 2139095040, %v717_v0  ;;  %v59_v2 = vand.u32 2147483647, %v717_v0  ;;  %v165_v6 = vand.u32 2139095040, %v721_v3  ;;  %v162_v15 = vand.u32 2147483647, %v721_v3 }
  0x28   :  { %v666_v19 = vmov 2475754826   ;;  %v667_v21 = vmov 2131351028   ;;  %v668_v23 = vmov 2102212464  }
  0x29   :  { %v63_v4 = vshrl.u32 %v62_v1, 23  ;;  %v66_v7 = vand.u32 8388607, %v59_v2  ;;  %v166_v9 = vshrl.u32 %v165_v6, 23  ;;  %v669_v25 = vmov 920167782  }
  0x2a   :  { %v670_v34 = vmov 1326507024   ;;  %v169_v50 = vand.u32 8388607, %v162_v15  ;;  %vm60_vm13 = vcmp.le.f32.partialorder %v59_v2, 0.7853982 }
  0x2b   :  { %v517_v5 = vadd.s32 4294967169, %v63_v4  ;;  %v67_v10 = vor.u32 8388608, %v66_v7  ;;  %v521_v12 = vadd.s32 4294967169, %v166_v9  ;;  %vm61_vm14 = vcmp.lt.s32.totalorder %v717_v0, 0  ;;  %s671_s1 = smov [#allocation7]   ;;  %s672_s9 = smov [#allocation8]  }
  0x2c   :  { %v170_v62 = vor.u32 8388608, %v169_v50  ;;  %s489_s8 = sshll.u32 %s671_s1, 4  ;;  %s499_s10 = sshll.u32 %s672_s9, 4  ;;  %s490_s8 = int_to_ptr.vmem [resolvable:$true] %s489_s8  ;;  %s500_s10 = int_to_ptr.vmem [resolvable:$true] %s499_s10 }
  0x2d   :  { %v69_v8 = vadd.s32 1, %v517_v5  ;;  %v107_v27 = vshll.u32 %v67_v10, 8  ;;  %v172_v28 = vadd.s32 1, %v521_v12  ;;  %s611_s11 = scalar_lea.vmem %s490_s8, 256  ;;  %p616_p3 = scmp.lt.s32.totalorder %s490_s8, %s490_s8 }
  0x2e   :  { %p612_p2 = scmp.ne.s32.totalorder %s490_s8, %s611_s11  ;;  %p617_p4 = scmp.lt.s32.totalorder %s611_s11, %s611_s11 }
  0x2f   :  { %vm70_vm0 = vcmp.gt.s32.totalorder %v69_v8, 0  ;;  %vm173_vm5 = vcmp.gt.s32.totalorder %v172_v28, 0 }
  0x30   :  { %v71_v11 = vsel %vm70_vm0, %v69_v8, 0  ;;  %v174_v51 = vsel %vm173_vm5, %v172_v28, 0  ;;  %v210_v28 = vshll.u32 %v170_v62, 8  ;;  %vm151_vm0 = vweird.f32 %v717_v0  ;;  %p618_p5 = por %p617_p4, %p616_p3 }
  0x31   :  { %v73_v13 = vand.u32 31, %v71_v11  ;;  %v72_v14 = vshrl.u32 %v71_v11, 5  ;;  %v175_v55 = vshrl.u32 %v174_v51, 5  ;;  %v176_v60 = vand.u32 31, %v174_v51  ;;  %v39_v51 = vld [vmem:[#allocation2] sm:$0xff] }
  0x32   :  { %p619_p6 = pnand %p618_p5, %p612_p2 }
  0x33   :  { %v74_v16 = vsub.s32 32, %v73_v13  ;;  %v76_v18 = vshll.u32 %v665_v17, %v73_v13  ;;  %v79_v20 = vshll.u32 %v666_v19, %v73_v13  ;;  %v82_v22 = vshll.u32 %v667_v21, %v73_v13 }
  0x34   :  { %v85_v24 = vshll.u32 %v668_v23, %v73_v13  ;;  %v88_v26 = vshll.u32 %v669_v25, %v73_v13  ;;  %vm91_vm1 = vcmp.lt.s32.totalorder %v72_v14, 1  ;;  %vm92_vm2 = vcmp.lt.s32.totalorder %v72_v14, 2 }
  0x35   :  { %v75_v29 = vshrl.u32 %v665_v17, %v74_v16  ;;  %v77_v30 = vshrl.u32 %v666_v19, %v74_v16  ;;  %v80_v31 = vshrl.u32 %v667_v21, %v74_v16  ;;  %v83_v32 = vshrl.u32 %v668_v23, %v74_v16 }
  0x36   :  { %v86_v33 = vshrl.u32 %v669_v25, %v74_v16  ;;  %v89_v35 = vshrl.u32 %v670_v34, %v74_v16  ;;  %vm94_vm3 = vcmp.lt.s32.totalorder %v72_v14, 4  ;;  %vm93_vm4 = vcmp.lt.s32.totalorder %v72_v14, 3 }
  0x37   :  { %v78_v36 = vor.u32 %v77_v30, %v76_v18  ;;  %v81_v37 = vor.u32 %v80_v31, %v79_v20  ;;  %v84_v38 = vor.u32 %v83_v32, %v82_v22  ;;  %vm194_vm6 = vcmp.lt.s32.totalorder %v175_v55, 1 }
  0x38   :  { %v87_v39 = vor.u32 %v86_v33, %v85_v24  ;;  %v90_v40 = vor.u32 %v89_v35, %v88_v26  ;;  %v177_v63 = vsub.s32 32, %v176_v60  ;;  %v179_v1 = vshll.u32 %v665_v17, %v176_v60 }
  0x39   :  { %v95_v41 = vsel %vm91_vm1, %v75_v29, %v78_v36  ;;  %v96_v42 = vsel %vm94_vm3, %v84_v38, 2102212464  ;;  %v99_v43 = vsel %vm91_vm1, %v78_v36, %v81_v37  ;;  %v103_v44 = vsel %vm91_vm1, %v81_v37, %v84_v38 }
  0x3a   :  { %v97_v45 = vsel %vm93_vm4, %v81_v37, %v96_v42  ;;  %v100_v46 = vsel %vm94_vm3, %v87_v39, 920167782  ;;  %v104_v47 = vsel %vm94_vm3, %v90_v40, 1326507024  ;;  %v182_v4 = vshll.u32 %v666_v19, %v176_v60 }
  0x3b   :  { %v101_v48 = vsel %vm93_vm4, %v84_v38, %v100_v46  ;;  %v105_v49 = vsel %vm93_vm4, %v87_v39, %v104_v47  ;;  %v98_v52 = vsel %vm92_vm2, %v95_v41, %v97_v45  ;;  %v185_v5 = vshll.u32 %v667_v21, %v176_v60 }
  0x3c   :  { %v102_v53 = vsel %vm92_vm2, %v99_v43, %v101_v48  ;;  %v106_v54 = vsel %vm92_vm2, %v103_v44, %v105_v49  ;;  %v114_v61 = vmul.u32 %v107_v27, %v98_v52  ;;  %v188_v7 = vshll.u32 %v668_v23, %v176_v60 }
  0x3d   :  { %v732_v56 = vmul.u32.u64.low %v107_v27, %v106_v54  ;;  %v733_v57 = vmul.u32.u64.high %v107_v27, %v106_v54, %v732_v56  ;;  %v735_v58 = vmul.u32.u64.low %v107_v27, %v102_v53  ;;  %v736_v59 = vmul.u32.u64.high %v107_v27, %v102_v53, %v735_v58 }
  0x3e   :  { %vm197_vm8 = vcmp.lt.s32.totalorder %v175_v55, 4  ;;  %v178_v8 = vshrl.u32 %v665_v17, %v177_v63  ;;  %v180_v9 = vshrl.u32 %v666_v19, %v177_v63  ;;  %v183_v10 = vshrl.u32 %v667_v21, %v177_v63 }
  0x3f   :  { %vm116_vm7 = vc.u32 %v733_v57, %v735_v58  ;;  %v117_v6 = vadd.s32 1, %v736_v59  ;;  %v186_v11 = vshrl.u32 %v668_v23, %v177_v63  ;;  %v189_v13 = vshrl.u32 %v669_v25, %v177_v63 }
  0x40   :  { %v191_v14 = vshll.u32 %v669_v25, %v176_v60  ;;  %v192_v16 = vshrl.u32 %v670_v34, %v177_v63  ;;  %v181_v20 = vor.u32 %v180_v9, %v179_v1  ;;  %v184_v22 = vor.u32 %v183_v10, %v182_v4 }
  0x41   :  { %v118_v12 = vsel %vm116_vm7, %v117_v6, %v736_v59  ;;  %v187_v24 = vor.u32 %v186_v11, %v185_v5  ;;  %v190_v26 = vor.u32 %v189_v13, %v188_v7  ;;  %vm196_vm9 = vcmp.lt.s32.totalorder %v175_v55, 3 }
  0x42   :  { %v119_v18 = vadd.s32 %v118_v12, %v114_v61  ;;  %v193_v27 = vor.u32 %v192_v16, %v191_v14  ;;  %vm195_vm10 = vcmp.lt.s32.totalorder %v175_v55, 2  ;;  %v202_v19 = vsel %vm194_vm6, %v181_v20, %v184_v22 }
  0x43   :  { %v199_v17 = vsel %vm197_vm8, %v187_v24, 2102212464  ;;  %v198_v21 = vsel %vm194_vm6, %v178_v8, %v181_v20  ;;  %v203_v23 = vsel %vm197_vm8, %v190_v26, 920167782  ;;  %v206_v25 = vsel %vm194_vm6, %v184_v22, %v187_v24 }
  0x44   :  { %v120_v29 = vadd.s32 536870912, %v119_v18  ;;  %v207_v30 = vsel %vm197_vm8, %v193_v27, 1326507024  ;;  %v200_v32 = vsel %vm196_vm9, %v184_v22, %v199_v17  ;;  %v204_v33 = vsel %vm196_vm9, %v187_v24, %v203_v23  ;;  %v40_v22 = vld [vmem:[#allocation2 + $0x8] sm:$0xff] }
  0x45   :  { %v208_v34 = vsel %vm196_vm9, %v190_v26, %v207_v30  ;;  %v205_v35 = vsel %vm195_vm10, %v202_v19, %v204_v33  ;;  %v201_v40 = vsel %vm195_vm10, %v198_v21, %v200_v32  ;;  %v115_v54 = vadd.s32 %v735_v58, %v733_v57 }
  0x46   :  { %v121_v31 = vshrl.u32 %v120_v29, 30  ;;  %v209_v36 = vsel %vm195_vm10, %v206_v25, %v208_v34  ;;  %v752_v41 = vmul.u32.u64.low %v210_v28, %v205_v35  ;;  %v753_v42 = vmul.u32.u64.high %v210_v28, %v205_v35, %v752_v41 }
  0x47   :  { %v749_v38 = vmul.u32.u64.low %v210_v28, %v209_v36  ;;  %v750_v39 = vmul.u32.u64.high %v210_v28, %v209_v36, %v749_v38  ;;  %v217_v45 = vmul.u32 %v210_v28, %v201_v40  ;;  %v49_v56 = vsub.f32 0.0, %v39_v51 }
  0x48   :  { %v122_v37 = vshll.u32 %v121_v31, 30  ;;  %v220_v46 = vadd.s32 1, %v753_v42  ;;  %v513_v1 = vadd.f32 -0.6931472, %v39_v51  ;;  %v145_v16 = vsub.s32 4, %v121_v31 }
  0x49   :  { %vm219_vm11 = vc.u32 %v750_v39, %v752_v41  ;;  %v515_v7 = vadd.f32 -0.6931472, %v49_v56  ;;  %v218_v28 = vadd.s32 %v752_v41, %v750_v39  ;;  %v50_v29 = vsub.f32 0.0, %v40_v22 }
  0x4a   :  { %v123_v43 = vsub.s32 %v119_v18, %v122_v37  ;;  %v221_v48 = vsel %vm219_vm11, %v220_v46, %v753_v42  ;;  %v45_v11 = vmul.f32 1.442695, %v513_v1  ;;  %v146_v27 = vsel %vm61_vm14, %v145_v16, %v121_v31 }
  0x4b   :  { %v222_v50 = vadd.s32 %v221_v48, %v217_v45  ;;  %v53_v13 = vmul.f32 1.442695, %v515_v7  ;;  %v148_v32 = vsel %vm60_vm13, 0, %v146_v27  ;;  %v514_v33 = vadd.f32 -0.6931472, %v40_v22 }
  0x4c   :  { %v125_v44 = vsub.s32 0, %v123_v43  ;;  %551 = vpow2.f32 %v45_v11  ;;  %v516_v35 = vadd.f32 -0.6931472, %v50_v29  ;;  %v364_v37 = vadd.s32 3, %v148_v32 }
  0x4d   :  { %v223_v53 = vadd.s32 536870912, %v222_v50  ;;  %553 = vpow2.f32 %v53_v13  ;;  %v47_v39 = vmul.f32 1.442695, %v514_v33  ;;  %vm772_vm1 = vcmp.le.f32.partialorder %v162_v15, 0.7853982 }
  0x4e   :  { %v518_v47 = vmin.u32 %v125_v44, %v123_v43  ;;  %v152_v44 = vand.u32 3, %v148_v32  ;;  %vm164_vm2 = vcmp.lt.s32.totalorder %v721_v3, 0 }
  0x4f   :  { %v760_v55 = vshrl.u32 %v223_v53, 30 }
  0x50   :  { %v127_v49 = vclz %v518_v47  ;;  %v365_v47 = vand.u32 3, %v364_v37  ;;  %vm157_vm3 = vcmp.eq.s32.totalorder %v152_v44, 2  ;;  %vm154_vm5 = vcmp.eq.s32.totalorder %v152_v44, 0 }
  0x51   :  { %v225_v63 = vshll.u32 %v760_v55, 30  ;;  %v248_v46 = vsub.s32 4, %v760_v55  ;;  %vm153_vm7 = vcmp.lt.s32.totalorder %v152_v44, 2 }
  0x52   :  { %v519_v52 = vadd.s32 4294967294, %v127_v49  ;;  %vm370_vm4 = vcmp.eq.s32.totalorder %v365_v47, 2  ;;  %vm367_vm6 = vcmp.eq.s32.totalorder %v365_v47, 0  ;;  %vm366_vm8 = vcmp.lt.s32.totalorder %v365_v47, 2 }
  0x53   :  { %v226_v6 = vsub.s32 %v222_v50, %v225_v63  ;;  %v249_v53 = vsel %vm164_vm2, %v248_v46, %v760_v55 }
  0x54   :  { %vm520_vm12 = vcmp.lt.s32.totalorder %v519_v52, 0  ;;  %v251_v63 = vsel %vm772_vm1, 0, %v249_v53 }
  0x55   :  { %v130_v59 = vsel %vm520_vm12, 0, %v519_v52  ;;  %v228_v10 = vsub.s32 0, %v226_v6 }
  0x56   :  { %v131_v60 = vsub.s32 32, %v130_v59  ;;  %v132_v61 = vshll.u32 %v123_v43, %v130_v59  ;;  %v135_v62 = vsub.s32 4294967266, %v130_v59  ;;  %v552_v38 = vpop.eup %551  ;;  %v55_v43 = vmul.f32 1.442695, %v516_v35 }
  0x57   :  { %v522_v12 = vmin.u32 %v228_v10, %v226_v6  ;;  %v554_v42 = vpop.eup %553 }
  0x58   :  { %v133_v4 = vshrl.u32 %v115_v54, %v131_v60  ;;  %v136_v5 = vadd.s32 127, %v135_v62  ;;  %v57_v49 = vsub.f32 %v552_v38, %v554_v42  ;;  %v269_v59 = vadd.f32 %v554_v42, %v552_v38 }
  0x59   :  { %v230_v18 = vclz %v522_v12  ;;  %v255_v12 = vand.u32 3, %v251_v63 }
  0x5a   :  { %v134_v8 = vor.u32 %v133_v4, %v132_v61  ;;  %v137_v9 = vshll.u32 %v136_v5, 23 }
  0x5b   :  { %v523_v24 = vadd.s32 4294967294, %v230_v18  ;;  %vm260_vm9 = vcmp.eq.s32.totalorder %v255_v12, 2  ;;  %vm257_vm11 = vcmp.eq.s32.totalorder %v255_v12, 0 }
  0x5c   :  { %v138_v57 = vor.u32 4788187, %v137_v9  ;;  %v141_v58 = vcvt.s32.f32 %v134_v8  ;;  %v468_v9 = vadd.s32 3, %v251_v63 }
  0x5d   :  { %vm524_vm15 = vcmp.lt.s32.totalorder %v523_v24, 0 }
  0x5e   :  { %v139_v14 = vand.u32 2147483647, %v138_v57  ;;  %v233_v17 = vsel %vm524_vm15, 0, %v523_v24  ;;  %v469_v13 = vand.u32 3, %v468_v9 }
  0x5f   :  { %v234_v21 = vsub.s32 32, %v233_v17  ;;  %v235_v23 = vshll.u32 %v226_v6, %v233_v17  ;;  %v238_v25 = vsub.s32 4294967266, %v233_v17 }
  0x60   :  { %v142_v20 = vmul.f32 %v141_v58, %v139_v14  ;;  %vm474_vm10 = vcmp.eq.s32.totalorder %v469_v13, 2  ;;  %vm471_vm12 = vcmp.eq.s32.totalorder %v469_v13, 0  ;;  %vm470_vm15 = vcmp.lt.s32.totalorder %v469_v13, 2 }
  0x61   :  { %v236_v34 = vshrl.u32 %v218_v28, %v234_v21  ;;  %v239_v2 = vadd.s32 127, %v238_v25 }
  0x62   :  { %v143_v26 = vxor.u32 2147483648, %v142_v20 }
  0x63   :  { %v237_v36 = vor.u32 %v236_v34, %v235_v23  ;;  %v240_v31 = vshll.u32 %v239_v2, 23 }
  0x64   :  { %v144_v19 = vsel %vm61_vm14, %v143_v26, %v142_v20  ;;  %vm256_vm14 = vcmp.lt.s32.totalorder %v255_v12, 2 }
  0x65   :  { %v147_v30 = vsel %vm60_vm13, %v717_v0, %v144_v19  ;;  %v241_v40 = vor.u32 4788187, %v240_v31  ;;  %v244_v41 = vcvt.s32.f32 %v237_v36  ;;  %vm254_vm13 = vweird.f32 %v721_v3 }
  0x66   :  { %555 = vcosq.f32 %v147_v30 }
  0x67   :  { %557 = vsinq.f32 %v147_v30  ;;  %v242_v45 = vand.u32 2147483647, %v241_v40 }
  0x68   :  { %559 = vpow2.f32 %v47_v39 }
  0x69   :  { %v245_v48 = vmul.f32 %v244_v41, %v242_v45  ;;  %561 = vpow2.f32 %v55_v43 }
  0x6b   :  { %v246_v52 = vxor.u32 2147483648, %v245_v48 }
  0x6d   :  { %v247_v61 = vsel %vm164_vm2, %v246_v52, %v245_v48 }
  0x6e   :  { %v250_v62 = vsel %vm772_vm1, %v721_v3, %v247_v61 }
  0x6f   :  { %563 = vcosq.f32 %v250_v62 }
  0x70   :  { %v556_v51 = vpop.eup %555  ;;  %565 = vsinq.f32 %v250_v62 }
  0x71   :  { %v558_v54 = vpop.eup %557  ;;  %v158_v56 = vxor.u32 2147483648, %v556_v51 }
  0x72   :  { %v155_v60 = vxor.u32 2147483648, %v558_v54  ;;  %v560_v57 = vpop.eup %559 }
  0x73   :  { %v159_v15 = vsel %vm157_vm3, %v158_v56, %v558_v54  ;;  %v372_v1 = vsel %vm370_vm4, %v158_v56, %v558_v54  ;;  %v562_v58 = vpop.eup %561 }
  0x74   :  { %v156_v55 = vsel %vm154_vm5, %v556_v51, %v155_v60  ;;  %v369_v4 = vsel %vm367_vm6, %v556_v51, %v155_v60  ;;  %v58_v20 = vsub.f32 %v560_v57, %v562_v58  ;;  %v270_v24 = vadd.f32 %v562_v58, %v560_v57 }
  0x75   :  { %v160_v5 = vsel %vm153_vm7, %v156_v55, %v159_v15  ;;  %v373_v6 = vsel %vm366_vm8, %v369_v4, %v372_v1 }
  0x76   :  { %v161_v7 = vsel %vm151_vm0, nan, %v160_v5  ;;  %v374_v8 = vsel %vm151_vm0, nan, %v373_v6 }
  0x77   :  { %v265_v10 = vmul.f32 %v161_v7, %v57_v49  ;;  %v479_v11 = vmul.f32 %v374_v8, %v269_v59 }
  0x79   :  { %267 = vst [vmem:[#allocation7] sm:$0xff] %v265_v10  ;;  %481 = vst [vmem:[#allocation8] sm:$0xff] %v479_v11  ;;  %v564_v14 = vpop.eup %563 }
  0x7a   :  { %v566_v16 = vpop.eup %565  ;;  %v261_v18 = vxor.u32 2147483648, %v564_v14 }
  0x7b   :  { %v258_v0 = vxor.u32 2147483648, %v566_v16 }
  0x7c   :  { %v262_v22 = vsel %vm260_vm9, %v261_v18, %v566_v16  ;;  %v476_v26 = vsel %vm474_vm10, %v261_v18, %v566_v16 }
  0x7d   :  { %v259_v27 = vsel %vm257_vm11, %v564_v14, %v258_v0  ;;  %v473_v28 = vsel %vm471_vm12, %v564_v14, %v258_v0 }
  0x7e   :  { %v263_v29 = vsel %vm256_vm14, %v259_v27, %v262_v22  ;;  %v477_v17 = vsel %vm470_vm15, %v473_v28, %v476_v26 }
  0x7f   :  { %v264_v19 = vsel %vm254_vm13, nan, %v263_v29  ;;  %v478_v21 = vsel %vm254_vm13, nan, %v477_v17 }
  0x80   :  { %v266_v23 = vmul.f32 %v264_v19, %v58_v20  ;;  %v480_v25 = vmul.f32 %v478_v21, %v270_v24 }
  0x82   :  { %268 = vst [vmem:[#allocation7 + $0x8] sm:$0xff] %v266_v23  ;;  %482 = vst [vmem:[#allocation8 + $0x8] sm:$0xff] %v480_v25 }
  0x83   :  { %622 = shalt.err (!%p619_p6)
}
  0x84   :  { %s623_s14 = scalar_lea.hbm %s818_s2, 256 }
  0x85   :  { %p624_p7 = scmp.ne.s32.totalorder %s818_s2, %s623_s14  ;;  %p627_p8 = scmp.lt.u32.totalorder %s623_s14, %s818_s2 }
  0x87   :  { %p629_p9 = pnand %p627_p8, %p624_p7 }
  0x89   :  { %632 = shalt.err (!%p629_p9)
}
  0x8a   :  { %492 = dma.vmem_to_hbm [thread:$0]  %s490_s8, 256, %s818_s2, [#allocation4]  }
  0x8b   :  { %s633_s21 = scalar_lea.vmem %s500_s10, 256  ;;  %p638_p11 = scmp.lt.s32.totalorder %s500_s10, %s500_s10 }
  0x8c   :  { %p634_p10 = scmp.ne.s32.totalorder %s500_s10, %s633_s21  ;;  %p639_p12 = scmp.lt.s32.totalorder %s633_s21, %s633_s21 }
  0x8e   :  { %p640_p13 = por %p639_p12, %p638_p11 }
  0x90   :  { %p641_p0 = pnand %p640_p13, %p634_p10 }
  0x92   :  { %644 = shalt.err (!%p641_p0)
}
  0x93   :  { %s645_s24 = scalar_lea.hbm %s819_s3, 256 }
  0x94   :  { %p646_p1 = scmp.ne.s32.totalorder %s819_s3, %s645_s24  ;;  %p649_p2 = scmp.lt.u32.totalorder %s645_s24, %s819_s3 }
  0x96   :  { %p651_p3 = pnand %p649_p2, %p646_p1 }
  0x98   :  { %654 = shalt.err (!%p651_p3)
}
  0x99   :  { %502 = dma.vmem_to_hbm [thread:$0]  %s500_s10, 256, %s819_s3, [#allocation9]  }
  0x9a   :  { %659 = dma.done.wait [#allocation4], 256  }
  0x9b   :  { %660 = vsyncadd [#allocation4], 4294967040 }
  0x9c   :  { %661 = dma.done.wait [#allocation9], 256  }
  0x9d   :  { %662 = vsyncadd [#allocation9], 4294967040 }
  0x9e   :  { %509 = vsyncpa [#allocation3], 1 }
  0x9f   :  { %510 = vsyncpa [#allocation6], 1 }
  0xa0   :  { %511 = vsyncpa [#allocation4], 1 }
  0xa1   :  { %512 = vsyncpa [#allocation9], 1 }

</bundles_post_ra>
